<compile_context>
chip_gen: v5e
topology: v5e:2x2
jax: 0.10.0
libtpu: 0.0.40
codegen_flags: <defaults>
</compile_context>

<pallas_src>
import functools

import jax
import jax.numpy as jnp
import numpy as np
from jax.experimental import pallas as pl
from jax.experimental.pallas import tpu as pltpu


# ---------------------------------------------------------------------------
# Tile selection helpers
# ---------------------------------------------------------------------------
def _pick_hw_tile(hw):
    """Lane-axis tile over the per-channel spatial extent (multiple of 128)."""
    for t in (2048, 1024, 512, 256, 128):
        if hw % t == 0:
            return t
    # TODO(synk): H*W not a multiple of 128 would need lane padding / masking.
    raise NotImplementedError("energy_based_loss requires H*W % 128 == 0")


def _pick_batch_tile(n):
    """Sublane-axis tile over the batch.  Multiple of 8 or the full extent."""
    for t in (128, 64, 32, 16, 8):
        if n % t == 0:
            return t
    return n                                          # full extent (tiny batch)


# ---------------------------------------------------------------------------
# Kernel
# ---------------------------------------------------------------------------
def _energy_loss_kernel(alpha_ref, xr_ref, xf_ref, a_ref, b_ref, out_ref,
                        er_acc, ef_acc, gp_acc, gsq_acc, *, abs_scale):
    hwi = pl.program_id(1)               # spatial chunk (reduction)
    ci = pl.program_id(2)                # channel (innermost reduction)
    n_hw = pl.num_programs(1)
    n_c = pl.num_programs(2)

    @pl.when(jnp.logical_and(hwi == 0, ci == 0))
    def _init():
        er_acc[...] = jnp.zeros_like(er_acc)
        ef_acc[...] = jnp.zeros_like(ef_acc)
        gp_acc[...] = jnp.zeros_like(gp_acc)

    @pl.when(ci == 0)
    def _reset_gsq():
        gsq_acc[...] = jnp.zeros_like(gsq_acc)

    # Stream at native dtype; widen per tile in-register (bf16-friendly).
    xr = xr_ref[...].astype(jnp.float32)             # (tile_n, T)
    xf = xf_ref[...].astype(jnp.float32)             # (tile_n, T)
    a = a_ref[...].astype(jnp.float32)               # (1, T)  sublane-broadcast
    b = b_ref[...].astype(jnp.float32)               # (1, T)
    alpha = alpha_ref[...].astype(jnp.float32)       # (tile_n, 1) lane-broadcast

    # Energy terms, factored as x*(0.5*a*x + b); reuse a*x for the grad below.
    ax_r = a * xr
    ax_f = a * xf
    er_acc[...] += jnp.sum(xr * (0.5 * ax_r + b), keepdims=True)
    ef_acc[...] += jnp.sum(xf * (0.5 * ax_f + b), keepdims=True)

    # grad / energy_scale at the interpolated point:
    #   a*(alpha*xr + (1-alpha)*xf) + b == ax_f + alpha*(ax_r - ax_f) + b
    g = ax_f + alpha * (ax_r - ax_f) + b             # (tile_n, T)
    gsq_acc[...] += g * g                            # channel-sum accumulator

    # Finish the channel reduction for this spatial chunk.
    @pl.when(ci == n_c - 1)
    def _grad_penalty():
        gnorm = abs_scale * jnp.sqrt(gsq_acc[...])   # (tile_n, T)
        gp_acc[...] += jnp.sum((gnorm - 1.0) ** 2, keepdims=True)

    # Single output write per batch tile (no per-step store traffic).
    @pl.when(jnp.logical_and(hwi == n_hw - 1, ci == n_c - 1))
    def _finalize():
        out_ref[:, 0:1] = er_acc[...]
        out_ref[:, 1:2] = ef_acc[...]
        out_ref[:, 2:3] = gp_acc[...]


# ---------------------------------------------------------------------------
# Wrapper
# ---------------------------------------------------------------------------
def energy_based_loss(x_real, x_fake, weight_a, weight_b, alpha,
                      energy_scale=1.0, regularization_weight=0.1):
    """x_real/x_fake: (N, C, H, W); weight_a/weight_b: (C, H*W); alpha: (N, 1)."""
    N, C, H, W = x_real.shape
    HW = H * W

    # Free row-major reshapes: batch on sublanes, (channel, spatial) on lanes.
    xr = x_real.reshape(N, C * HW)
    xf = x_fake.reshape(N, C * HW)
    a2d = weight_a.reshape(1, C * HW)
    b2d = weight_b.reshape(1, C * HW)
    al = alpha.reshape(N, 1).astype(jnp.float32)

    tile_n = _pick_batch_tile(N)
    tile_hw = _pick_hw_tile(HW)
    nhw_blocks = HW // tile_hw
    grid = (N // tile_n, nhw_blocks, C)

    kernel = functools.partial(_energy_loss_kernel,
                               abs_scale=abs(float(energy_scale)))

    x_bytes = int(xr.size) * xr.dtype.itemsize
    w_bytes = int(a2d.size) * a2d.dtype.itemsize
    cost = pl.CostEstimate(
        flops=int(14 * N * C * HW),
        transcendentals=int(N * HW),
        bytes_accessed=int(2 * x_bytes + 2 * grid[0] * w_bytes
                           + N * 4 + grid[0] * 12))

    per_step_bytes = (2 * tile_n * tile_hw * xr.dtype.itemsize    # xr + xf
                      + 2 * tile_hw * a2d.dtype.itemsize          # a + b
                      + tile_n * tile_hw * 4                      # gsq scratch
                      + tile_n * 4 + 3 * 4 + 12)                  # alpha + accs
    # Explicit scoped-VMEM budget (covers double-buffering; fits v7x 64 MiB).
    vmem_limit = int(min(64 * 1024 * 1024,
                         max(8 * 1024 * 1024, 6 * per_step_bytes)))

    partials = pl.pallas_call(
        kernel,
        out_shape=jax.ShapeDtypeStruct((grid[0], 3), jnp.float32),
        grid_spec=pltpu.PrefetchScalarGridSpec(
            num_scalar_prefetch=0,
            grid=grid,
            in_specs=[
                # alpha: per-sample, shared across all reduction steps.
                pl.BlockSpec((tile_n, 1), lambda ni, hwi, ci: (ni, 0)),
                # x_real / x_fake: lane block = channel * spatial-chunk.
                pl.BlockSpec((tile_n, tile_hw),
                             lambda ni, hwi, ci: (ni, ci * nhw_blocks + hwi)),
                pl.BlockSpec((tile_n, tile_hw),
                             lambda ni, hwi, ci: (ni, ci * nhw_blocks + hwi)),
                # A / B: compact (1, tile_hw) blocks shared by every batch tile.
                pl.BlockSpec((1, tile_hw),
                             lambda ni, hwi, ci: (0, ci * nhw_blocks + hwi)),
                pl.BlockSpec((1, tile_hw),
                             lambda ni, hwi, ci: (0, ci * nhw_blocks + hwi)),
            ],
            out_specs=pl.BlockSpec((1, 3), lambda ni, hwi, ci: (ni, 0)),
            scratch_shapes=[pltpu.VMEM((1, 1), jnp.float32),          # E_real
                            pltpu.VMEM((1, 1), jnp.float32),          # E_fake
                            pltpu.VMEM((1, 1), jnp.float32),          # grad pen
                            pltpu.VMEM((tile_n, tile_hw), jnp.float32)],  # |g|^2
        ),
        compiler_params=pltpu.CompilerParams(
            dimension_semantics=("parallel", "arbitrary", "arbitrary"),
            vmem_limit_bytes=vmem_limit),
        cost_estimate=cost,
    )(al, xr, xf, a2d, b2d)

    # Combine per-batch-tile partial sums.
    er = jnp.sum(partials[:, 0])
    ef = jnp.sum(partials[:, 1])
    gp = jnp.sum(partials[:, 2])
    cd_loss = energy_scale * (er - ef) / N            # mean(E_r) - mean(E_f)
    gradient_penalty = gp / (N * HW)                  # mean over (N, H, W)
    return cd_loss + regularization_weight * gradient_penalty


# ---------------------------------------------------------------------------
# Pure-JAX reference (mirrors the PyTorch forward with the same energy)
# ---------------------------------------------------------------------------
def _reference(x_real, x_fake, weight_a, weight_b, alpha,
               energy_scale=1.0, regularization_weight=0.1):
    N, C, H, W = x_real.shape
    a = weight_a.reshape(1, C, H * W)
    b = weight_b.reshape(1, C, H * W)

    def energy(x):
        xf = x.reshape(N, C, H * W).astype(jnp.float32)
        return energy_scale * jnp.sum(0.5 * a * xf * xf + b * xf, axis=(1, 2))

    cd = jnp.mean(energy(x_real)) - jnp.mean(energy(x_fake))
    al = alpha.reshape(N, 1, 1, 1)
    interp = al * x_real + (1.0 - al) * x_fake
    grads = jax.grad(lambda x: jnp.sum(energy(x)))(interp)          # (N,C,H,W)
    gnorm = jnp.sqrt(jnp.sum(grads * grads, axis=1))                 # (N,H,W)
    gp = jnp.mean((gnorm - 1.0) ** 2)
    return cd + regularization_weight * gp


if __name__ == "__main__":
    key = jax.random.PRNGKey(0)
    k_real, k_fake, k_a, k_b, k_alpha = jax.random.split(key, 5)

    N, C, H, W = 2, 4, 16, 16
    x_real = jax.random.normal(k_real, (N, C, H, W), dtype=jnp.float32)
    x_fake = jax.random.normal(k_fake, (N, C, H, W), dtype=jnp.float32)

    # Deterministic synthetic energy-function parameters.
    weight_a = 0.1 * jax.random.normal(k_a, (C, H * W), dtype=jnp.float32) + 1.0
    weight_b = 0.05 * jax.random.normal(k_b, (C, H * W), dtype=jnp.float32)

    # alpha ~ U[0,1) per sample (torch.rand(batch,1,1,1) analogue).
    alpha = jax.random.uniform(k_alpha, (N, 1), dtype=jnp.float32)

    loss = energy_based_loss(x_real, x_fake, weight_a, weight_b, alpha,
                             energy_scale=1.0, regularization_weight=0.1)
    loss = jax.block_until_ready(loss)

    ref = _reference(x_real, x_fake, weight_a, weight_b, alpha,
                     energy_scale=1.0, regularization_weight=0.1)
    np.testing.assert_allclose(np.asarray(loss), np.asarray(ref),
                               rtol=1e-4, atol=1e-4)
    print("KERNEL_OK")
</pallas_src>

<mosaic_0001>
module attributes {stable_mosaic.version = 11 : i64} {
  func.func @_energy_loss_kernel(%arg0: i32, %arg1: i32, %arg2: i32, %arg3: memref<2x1xf32, #tpu.memory_space<vmem>>, %arg4: memref<2x256xf32, #tpu.memory_space<vmem>>, %arg5: memref<2x256xf32, #tpu.memory_space<vmem>>, %arg6: memref<1x256xf32, #tpu.memory_space<vmem>>, %arg7: memref<1x256xf32, #tpu.memory_space<vmem>>, %arg8: memref<1x3xf32, #tpu.memory_space<vmem>>, %arg9: memref<1x1xf32, #tpu.memory_space<vmem>>, %arg10: memref<1x1xf32, #tpu.memory_space<vmem>>, %arg11: memref<1x1xf32, #tpu.memory_space<vmem>>, %arg12: memref<2x256xf32, #tpu.memory_space<vmem>>) attributes {dimension_semantics = [#tpu.dimension_semantics<parallel>, #tpu.dimension_semantics<arbitrary>, #tpu.dimension_semantics<arbitrary>], iteration_bounds = array<i64: 1, 1, 4>, scalar_prefetch = 0 : i64, scratch_operands = 4 : i64, tpu.core_type = #tpu.core_type<tc>, window_params = [{transform_indices = @transform_0, window_bounds = array<i64: 2, 1>}, {transform_indices = @transform_1, window_bounds = array<i64: 2, 256>}, {transform_indices = @transform_2, window_bounds = array<i64: 2, 256>}, {transform_indices = @transform_3, window_bounds = array<i64: 1, 256>}, {transform_indices = @transform_4, window_bounds = array<i64: 1, 256>}, {transform_indices = @transform_5, window_bounds = array<i64: 1, 3>}]} {
    %c0_i32 = arith.constant 0 : i32
    %0 = arith.cmpi eq, %arg1, %c0_i32 : i32
    %c0_i32_0 = arith.constant 0 : i32
    %1 = arith.cmpi eq, %arg2, %c0_i32_0 : i32
    %2 = arith.andi %0, %1 : i1
    %3 = arith.extui %2 : i1 to i32
    %c0_i32_1 = arith.constant 0 : i32
    %4 = arith.cmpi ne, %3, %c0_i32_1 : i32
    scf.if %4 {
      %cst_32 = arith.constant 0.000000e+00 : f32
      %61 = vector.broadcast %cst_32 : f32 to vector<1x1xf32>
      %c0_33 = arith.constant 0 : index
      %c0_34 = arith.constant 0 : index
      %62 = vector.load %arg9[%c0_33, %c0_34] : memref<1x1xf32, #tpu.memory_space<vmem>>, vector<1x1xf32>
      tpu.vector_store %arg9[%c0_33, %c0_34], %61 {strides = array<i32>} : memref<1x1xf32, #tpu.memory_space<vmem>>, vector<1x1xf32>,
      %cst_35 = arith.constant 0.000000e+00 : f32
      %63 = vector.broadcast %cst_35 : f32 to vector<1x1xf32>
      %c0_36 = arith.constant 0 : index
      %c0_37 = arith.constant 0 : index
      %64 = vector.load %arg10[%c0_36, %c0_37] : memref<1x1xf32, #tpu.memory_space<vmem>>, vector<1x1xf32>
      tpu.vector_store %arg10[%c0_36, %c0_37], %63 {strides = array<i32>} : memref<1x1xf32, #tpu.memory_space<vmem>>, vector<1x1xf32>,
      %cst_38 = arith.constant 0.000000e+00 : f32
      %65 = vector.broadcast %cst_38 : f32 to vector<1x1xf32>
      %c0_39 = arith.constant 0 : index
      %c0_40 = arith.constant 0 : index
      %66 = vector.load %arg11[%c0_39, %c0_40] : memref<1x1xf32, #tpu.memory_space<vmem>>, vector<1x1xf32>
      tpu.vector_store %arg11[%c0_39, %c0_40], %65 {strides = array<i32>} : memref<1x1xf32, #tpu.memory_space<vmem>>, vector<1x1xf32>,
    } else {
    }
    %c0_i32_2 = arith.constant 0 : i32
    %5 = arith.cmpi eq, %arg2, %c0_i32_2 : i32
    %6 = arith.extui %5 : i1 to i32
    %c0_i32_3 = arith.constant 0 : i32
    %7 = arith.cmpi ne, %6, %c0_i32_3 : i32
    scf.if %7 {
      %cst_32 = arith.constant 0.000000e+00 : f32
      %61 = vector.broadcast %cst_32 : f32 to vector<2x256xf32>
      %c0_33 = arith.constant 0 : index
      %c0_34 = arith.constant 0 : index
      %62 = vector.load %arg12[%c0_33, %c0_34] : memref<2x256xf32, #tpu.memory_space<vmem>>, vector<2x256xf32>
      tpu.vector_store %arg12[%c0_33, %c0_34], %61 {strides = array<i32>} : memref<2x256xf32, #tpu.memory_space<vmem>>, vector<2x256xf32>,
    } else {
    }
    %c0 = arith.constant 0 : index
    %c0_4 = arith.constant 0 : index
    %8 = vector.load %arg4[%c0, %c0_4] : memref<2x256xf32, #tpu.memory_space<vmem>>, vector<2x256xf32>
    %c0_5 = arith.constant 0 : index
    %c0_6 = arith.constant 0 : index
    %9 = vector.load %arg5[%c0_5, %c0_6] : memref<2x256xf32, #tpu.memory_space<vmem>>, vector<2x256xf32>
    %c0_7 = arith.constant 0 : index
    %c0_8 = arith.constant 0 : index
    %10 = vector.load %arg6[%c0_7, %c0_8] : memref<1x256xf32, #tpu.memory_space<vmem>>, vector<1x256xf32>
    %c0_9 = arith.constant 0 : index
    %c0_10 = arith.constant 0 : index
    %11 = vector.load %arg7[%c0_9, %c0_10] : memref<1x256xf32, #tpu.memory_space<vmem>>, vector<1x256xf32>
    %c0_11 = arith.constant 0 : index
    %c0_12 = arith.constant 0 : index
    %12 = vector.load %arg3[%c0_11, %c0_12] : memref<2x1xf32, #tpu.memory_space<vmem>>, vector<2x1xf32>
    %13 = vector.broadcast %10 : vector<1x256xf32> to vector<2x256xf32>
    %14 = arith.mulf %13, %8 : vector<2x256xf32>
    %15 = vector.broadcast %10 : vector<1x256xf32> to vector<2x256xf32>
    %16 = arith.mulf %15, %9 : vector<2x256xf32>
    %c0_13 = arith.constant 0 : index
    %c0_14 = arith.constant 0 : index
    %17 = vector.load %arg9[%c0_13, %c0_14] : memref<1x1xf32, #tpu.memory_space<vmem>>, vector<1x1xf32>
    %cst = arith.constant 5.000000e-01 : f32
    %18 = vector.broadcast %cst : f32 to vector<2x256xf32>
    %19 = arith.mulf %18, %14 : vector<2x256xf32>
    %20 = vector.broadcast %11 : vector<1x256xf32> to vector<2x256xf32>
    %21 = arith.addf %19, %20 : vector<2x256xf32>
    %22 = arith.mulf %8, %21 : vector<2x256xf32>
    %23 = vector.shape_cast %22 : vector<2x256xf32> to vector<1x2x256xf32>
    %cst_15 = arith.constant dense<0.000000e+00> : vector<1xf32>
    %24 = vector.multi_reduction <add>, %23, %cst_15 [1, 2] : vector<1x2x256xf32> to vector<1xf32>
    %25 = vector.shape_cast %24 : vector<1xf32> to vector<1x1x1xf32>
    %26 = vector.extract %25[0, 0, 0] : f32 from vector<1x1x1xf32>
    %27 = vector.broadcast %26 : f32 to vector<1x1xf32>
    %28 = arith.addf %17, %27 : vector<1x1xf32>
    %c0_16 = arith.constant 0 : index
    %c0_17 = arith.constant 0 : index
    %29 = vector.load %arg9[%c0_16, %c0_17] : memref<1x1xf32, #tpu.memory_space<vmem>>, vector<1x1xf32>
    tpu.vector_store %arg9[%c0_16, %c0_17], %28 {strides = array<i32>} : memref<1x1xf32, #tpu.memory_space<vmem>>, vector<1x1xf32>,
    %c0_18 = arith.constant 0 : index
    %c0_19 = arith.constant 0 : index
    %30 = vector.load %arg10[%c0_18, %c0_19] : memref<1x1xf32, #tpu.memory_space<vmem>>, vector<1x1xf32>
    %cst_20 = arith.constant 5.000000e-01 : f32
    %31 = vector.broadcast %cst_20 : f32 to vector<2x256xf32>
    %32 = arith.mulf %31, %16 : vector<2x256xf32>
    %33 = vector.broadcast %11 : vector<1x256xf32> to vector<2x256xf32>
    %34 = arith.addf %32, %33 : vector<2x256xf32>
    %35 = arith.mulf %9, %34 : vector<2x256xf32>
    %36 = vector.shape_cast %35 : vector<2x256xf32> to vector<1x2x256xf32>
    %cst_21 = arith.constant dense<0.000000e+00> : vector<1xf32>
    %37 = vector.multi_reduction <add>, %36, %cst_21 [1, 2] : vector<1x2x256xf32> to vector<1xf32>
    %38 = vector.shape_cast %37 : vector<1xf32> to vector<1x1x1xf32>
    %39 = vector.extract %38[0, 0, 0] : f32 from vector<1x1x1xf32>
    %40 = vector.broadcast %39 : f32 to vector<1x1xf32>
    %41 = arith.addf %30, %40 : vector<1x1xf32>
    %c0_22 = arith.constant 0 : index
    %c0_23 = arith.constant 0 : index
    %42 = vector.load %arg10[%c0_22, %c0_23] : memref<1x1xf32, #tpu.memory_space<vmem>>, vector<1x1xf32>
    tpu.vector_store %arg10[%c0_22, %c0_23], %41 {strides = array<i32>} : memref<1x1xf32, #tpu.memory_space<vmem>>, vector<1x1xf32>,
    %43 = arith.subf %14, %16 : vector<2x256xf32>
    %44 = vector.broadcast %12 : vector<2x1xf32> to vector<2x256xf32>
    %45 = arith.mulf %44, %43 : vector<2x256xf32>
    %46 = arith.addf %16, %45 : vector<2x256xf32>
    %47 = vector.broadcast %11 : vector<1x256xf32> to vector<2x256xf32>
    %48 = arith.addf %46, %47 : vector<2x256xf32>
    %c0_24 = arith.constant 0 : index
    %c0_25 = arith.constant 0 : index
    %49 = vector.load %arg12[%c0_24, %c0_25] : memref<2x256xf32, #tpu.memory_space<vmem>>, vector<2x256xf32>
    %50 = arith.mulf %48, %48 : vector<2x256xf32>
    %51 = arith.addf %49, %50 : vector<2x256xf32>
    %c0_26 = arith.constant 0 : index
    %c0_27 = arith.constant 0 : index
    %52 = vector.load %arg12[%c0_26, %c0_27] : memref<2x256xf32, #tpu.memory_space<vmem>>, vector<2x256xf32>
    tpu.vector_store %arg12[%c0_26, %c0_27], %51 {strides = array<i32>} : memref<2x256xf32, #tpu.memory_space<vmem>>, vector<2x256xf32>,
    %c3_i32 = arith.constant 3 : i32
    %53 = arith.cmpi eq, %arg2, %c3_i32 : i32
    %54 = arith.extui %53 : i1 to i32
    %c0_i32_28 = arith.constant 0 : i32
    %55 = arith.cmpi ne, %54, %c0_i32_28 : i32
    scf.if %55 {
      %c0_32 = arith.constant 0 : index
      %c0_33 = arith.constant 0 : index
      %61 = vector.load %arg12[%c0_32, %c0_33] : memref<2x256xf32, #tpu.memory_space<vmem>>, vector<2x256xf32>
      %62 = math.sqrt %61 : vector<2x256xf32>
      %cst_34 = arith.constant 1.000000e+00 : f32
      %63 = vector.broadcast %cst_34 : f32 to vector<2x256xf32>
      %64 = arith.mulf %63, %62 : vector<2x256xf32>
      %c0_35 = arith.constant 0 : index
      %c0_36 = arith.constant 0 : index
      %65 = vector.load %arg11[%c0_35, %c0_36] : memref<1x1xf32, #tpu.memory_space<vmem>>, vector<1x1xf32>
      %cst_37 = arith.constant 1.000000e+00 : f32
      %66 = vector.broadcast %cst_37 : f32 to vector<2x256xf32>
      %67 = arith.subf %64, %66 : vector<2x256xf32>
      %68 = arith.mulf %67, %67 : vector<2x256xf32>
      %69 = vector.shape_cast %68 : vector<2x256xf32> to vector<1x2x256xf32>
      %cst_38 = arith.constant dense<0.000000e+00> : vector<1xf32>
      %70 = vector.multi_reduction <add>, %69, %cst_38 [1, 2] : vector<1x2x256xf32> to vector<1xf32>
      %71 = vector.shape_cast %70 : vector<1xf32> to vector<1x1x1xf32>
      %72 = vector.extract %71[0, 0, 0] : f32 from vector<1x1x1xf32>
      %73 = vector.broadcast %72 : f32 to vector<1x1xf32>
      %74 = arith.addf %65, %73 : vector<1x1xf32>
      %c0_39 = arith.constant 0 : index
      %c0_40 = arith.constant 0 : index
      %75 = vector.load %arg11[%c0_39, %c0_40] : memref<1x1xf32, #tpu.memory_space<vmem>>, vector<1x1xf32>
      tpu.vector_store %arg11[%c0_39, %c0_40], %74 {strides = array<i32>} : memref<1x1xf32, #tpu.memory_space<vmem>>, vector<1x1xf32>,
    } else {
    }
    %c0_i32_29 = arith.constant 0 : i32
    %56 = arith.cmpi eq, %arg1, %c0_i32_29 : i32
    %c3_i32_30 = arith.constant 3 : i32
    %57 = arith.cmpi eq, %arg2, %c3_i32_30 : i32
    %58 = arith.andi %56, %57 : i1
    %59 = arith.extui %58 : i1 to i32
    %c0_i32_31 = arith.constant 0 : i32
    %60 = arith.cmpi ne, %59, %c0_i32_31 : i32
    scf.if %60 {
      %c0_32 = arith.constant 0 : index
      %c0_33 = arith.constant 0 : index
      %61 = vector.load %arg9[%c0_32, %c0_33] : memref<1x1xf32, #tpu.memory_space<vmem>>, vector<1x1xf32>
      %c0_34 = arith.constant 0 : index
      %c0_35 = arith.constant 0 : index
      %62 = vector.load %arg8[%c0_34, %c0_35] : memref<1x3xf32, #tpu.memory_space<vmem>>, vector<1x1xf32>
      tpu.vector_store %arg8[%c0_34, %c0_35], %61 {strides = array<i32>} : memref<1x3xf32, #tpu.memory_space<vmem>>, vector<1x1xf32>,
      %c0_36 = arith.constant 0 : index
      %c0_37 = arith.constant 0 : index
      %63 = vector.load %arg10[%c0_36, %c0_37] : memref<1x1xf32, #tpu.memory_space<vmem>>, vector<1x1xf32>
      %c0_38 = arith.constant 0 : index
      %c1 = arith.constant 1 : index
      %64 = vector.load %arg8[%c0_38, %c1] : memref<1x3xf32, #tpu.memory_space<vmem>>, vector<1x1xf32>
      tpu.vector_store %arg8[%c0_38, %c1], %63 {strides = array<i32>} : memref<1x3xf32, #tpu.memory_space<vmem>>, vector<1x1xf32>,
      %c0_39 = arith.constant 0 : index
      %c0_40 = arith.constant 0 : index
      %65 = vector.load %arg11[%c0_39, %c0_40] : memref<1x1xf32, #tpu.memory_space<vmem>>, vector<1x1xf32>
      %c0_41 = arith.constant 0 : index
      %c2 = arith.constant 2 : index
      %66 = vector.load %arg8[%c0_41, %c2] : memref<1x3xf32, #tpu.memory_space<vmem>>, vector<1x1xf32>
      tpu.vector_store %arg8[%c0_41, %c2], %65 {strides = array<i32>} : memref<1x3xf32, #tpu.memory_space<vmem>>, vector<1x1xf32>,
    } else {
    }
    return
  }
  func.func @transform_0(%arg0: i32, %arg1: i32, %arg2: i32) -> (i32, i32) {
    %c0_i32 = arith.constant 0 : i32
    %c0_i32_0 = arith.constant 0 : i32
    return %arg0, %c0_i32 : i32, i32
  }
  func.func @transform_1(%arg0: i32, %arg1: i32, %arg2: i32) -> (i32, i32) {
    %c1_i32 = arith.constant 1 : i32
    %0 = arith.muli %arg2, %c1_i32 : i32
    %1 = arith.addi %0, %arg1 : i32
    %c0_i32 = arith.constant 0 : i32
    return %arg0, %1 : i32, i32
  }
  func.func @transform_2(%arg0: i32, %arg1: i32, %arg2: i32) -> (i32, i32) {
    %c1_i32 = arith.constant 1 : i32
    %0 = arith.muli %arg2, %c1_i32 : i32
    %1 = arith.addi %0, %arg1 : i32
    %c0_i32 = arith.constant 0 : i32
    return %arg0, %1 : i32, i32
  }
  func.func @transform_3(%arg0: i32, %arg1: i32, %arg2: i32) -> (i32, i32) {
    %c1_i32 = arith.constant 1 : i32
    %0 = arith.muli %arg2, %c1_i32 : i32
    %1 = arith.addi %0, %arg1 : i32
    %c0_i32 = arith.constant 0 : i32
    %c0_i32_0 = arith.constant 0 : i32
    return %c0_i32, %1 : i32, i32
  }
  func.func @transform_4(%arg0: i32, %arg1: i32, %arg2: i32) -> (i32, i32) {
    %c1_i32 = arith.constant 1 : i32
    %0 = arith.muli %arg2, %c1_i32 : i32
    %1 = arith.addi %0, %arg1 : i32
    %c0_i32 = arith.constant 0 : i32
    %c0_i32_0 = arith.constant 0 : i32
    return %c0_i32, %1 : i32, i32
  }
  func.func @transform_5(%arg0: i32, %arg1: i32, %arg2: i32) -> (i32, i32) {
    %c0_i32 = arith.constant 0 : i32
    %c0_i32_0 = arith.constant 0 : i32
    return %arg0, %c0_i32 : i32, i32
  }
}

</mosaic_0001>

<bundles_post_ra>
// kernel: tpu_custom_call.1
= control target key start
LH: loop header
LB: loop body
LE: loop exit
PB: predicated region body
PF: predicated region fallthrough
CT: control target
= control target key end

     0   :  { %s1300_s0 = inlined_call_operand.vmem [shape: f32[2,1], index: 0, kind: input, shape index: {}]   ;;  %s1301_s1 = inlined_call_operand.hbm [shape: f32[2,1024], index: 1, kind: input, shape index: {}]   ;;  %s1302_s2 = inlined_call_operand.hbm [shape: f32[2,1024], index: 2, kind: input, shape index: {}]   ;;  %s1303_s3 = inlined_call_operand.hbm [shape: f32[1,1024], index: 3, kind: input, shape index: {}]   ;;  %s1304_s4 = inlined_call_operand.hbm [shape: f32[1,1024], index: 4, kind: input, shape index: {}]   ;;  %s1305_s5 = inlined_call_operand.hbm [shape: f32[1,3], index: 5, kind: output, shape index: {}]  }
   0x1   :  { %1307 = sst [smem:[#allocation21_spill]] %s1301_s1 }
   0x2   :  { %1308 = sst [smem:[#allocation22_spill]] %s1302_s2 }
   0x3   :  { %10 = vsyncpa [#allocation7], 0 }
   0x4   :  { %12 = vsyncpa [#allocation7 + $0x1], 0 }
   0x5   :  { %13 = vsyncpa [#allocation10], 0 }
   0x6   :  { %15 = vsyncpa [#allocation10 + $0x1], 0 }
   0x7   :  { %16 = vsyncpa [#allocation13], 0 }
   0x8   :  { %18 = vsyncpa [#allocation13 + $0x1], 0 }
   0x9   :  { %19 = vsyncpa [#allocation8], 0  ;;  %s1150_s18 = smov 0   ;;  %s1152_s19 = smov 0  }
   0xa   :  { %s1154_s20 = smov 0   ;;  %s1156_s21 = smov 0  }
   0xb   :  { %s1158_s22 = smov 0   ;;  %s1160_s23 = smov 0  }
   0xc LB: > { %s1179_s24 = sadd.s32 4294967295, %s1112_s23   ;;  %s37_s25 = sadd.s32 1, %s1108_s22  ;;  %s1112_s23 = sphi %s1160_s23, %s25_s23   ;;  %s1108_s22 = sphi %s1158_s22, %s1322_s22   ;;  %s1104_s21 = sphi %s1156_s21, %s1321_s21   ;;  %s1100_s20 = sphi %s1154_s20, %s1320_s20   ;;  %s1096_s19 = sphi %s1152_s19, %s1319_s19   ;;  %s1092_s18 = sphi %s1150_s18, %s1318_s18  }
   0xd   : > { %p38_p0 = scmp.ge.s32.totalorder %s37_s25, 4  ;;  %s81_s26 = sadd.s32 1, %s1100_s20 }
   0xe   : > { %p88_p1 = scmp.ne.s32.totalorder %s1100_s20, %s1096_s19  ;;  %p89_p2 = scmp.eq.s32.totalorder %s1112_s23, 0 }
   0xf   : > { %s1324_s25 = smov (%p38_p0, %s37_s25), 0  ;;  %p94_p4 = scmp.ne.s32.totalorder %s1096_s19, %s1092_s18 }
  0x10   : > { %1309 = sst [smem:[#allocation19_spill]] %s1324_s25  ;;  %p90_p3 = por %p89_p2, %p88_p1 }
  0x11   : > { %s77_s27 = ssub.s32 %s1108_s22, %s1324_s25  ;;  %p95_p5 = scmp.eq.s32.totalorder %s1179_s24, 0 }
  0x12   : > { %p79_p6 = scmp.eq.s32.totalorder %s77_s27, 0  ;;  %p839_p8 = scmp.lt.s32.totalorder %s1112_s23, 4 }
  0x13   : > { %p1192_p7 = por %p95_p5, %p94_p4  ;;  %s1201_s30 = sand.u32 1, %s1100_s20  }
  0x14   : > { %s1198_s29 = scalar_select %p79_p6, %s1100_s20, %s81_s26  }
  0x15   : > { %s804_s6 = sshll.u32 %s1108_s22, 2  ;;  %s780_s7 = sshll.u32 %s1201_s30, 2 }
  0x16   : > { %1311 = sst [smem:[#allocation20_spill]] %s1198_s29  ;;  %p1205_p9 = pnand %p839_p8, %p90_p3 }
  0x17   : > { %s260_s9 = sand.u32 1, %s1112_s23   ;;  %s1313_s2 = sld [smem:[#allocation22_spill]] }
  0x18   : > { %s264_s13 = scalar_lea.vmem [#allocation9], %s780_s7  ;;  %p790_p10 = scmp.ge.s32.totalorder %s1112_s23, 1 }
  0x19   : > { %s276_s14 = sshll.u32 %s264_s13, 4  ;;  %s261_s16 = scalar_lea.sflag [#allocation10], %s260_s9  ;;  %s277_s14 = int_to_ptr.vmem [resolvable:$true] %s276_s14 }
  0x1a   : > { %p321_p11 = scmp.lt.s32.totalorder %s1112_s23, 5  ;;  %s1315_s1 = sld [smem:[#allocation21_spill]] }
  0x1b   : > { %s241_s10 = scalar_lea.vmem [#allocation6], %s780_s7  ;;  %s786_s13 = sshll.u32 %s1201_s30, 1 }
  0x1c   : > { %p1217_p12 = pnand %p790_p10, %p321_p11  ;;  %s253_s11 = sshll.u32 %s241_s10, 4  ;;  %s254_s11 = int_to_ptr.vmem [resolvable:$true] %s253_s11 }
  0x1d   : > { %s272_s12 = scalar_lea.hbm %s1313_s2, %s804_s6  ;;  %s238_s2 = scalar_lea.sflag [#allocation7], %s1201_s30 }
  0x1e   : > { %s274_s15 = sshll.u32 %s272_s12, 4  ;;  %s787_s9 = sshll.u32 %s1108_s22, 1  ;;  %s275_s15 = int_to_ptr.hbm [resolvable:$true] %s274_s15 }
  0x1f   : > { %832 = dma.hbm_to_vmem [thread:$0]  (!%p1205_p9), %s275_s15, 64, %s277_s14, %s261_s16  }
  0x20   : > { %s249_s27 = scalar_lea.hbm %s1315_s1, %s804_s6  ;;  %s292_s25 = scalar_lea.hbm %s1303_s3, %s787_s9 }
  0x21   : > { %s251_s12 = sshll.u32 %s249_s27, 4  ;;  %s287_s29 = scalar_lea.vmem [#allocation11], %s786_s13  ;;  %s252_s12 = int_to_ptr.hbm [resolvable:$true] %s251_s12 }
  0x22   : > { %829 = dma.hbm_to_vmem [thread:$0]  (!%p1205_p9), %s252_s12, 64, %s254_s11, %s238_s2  }
  0x23   : > { %s296_s18 = sshll.u32 %s287_s29, 4  ;;  %s294_s6 = sshll.u32 %s292_s25, 4  ;;  %s297_s18 = int_to_ptr.vmem [resolvable:$true] %s296_s18  ;;  %s295_s6 = int_to_ptr.hbm [resolvable:$true] %s294_s6 }
  0x24   : > { %835 = dma.hbm_to_vmem [thread:$0]  (!%p1205_p9), %s295_s6, 32, %s297_s18, %s261_s16  }
  0x25   : > { %s312_s27 = scalar_lea.hbm %s1304_s4, %s787_s9  ;;  %s307_s1 = scalar_lea.vmem [#allocation12], %s786_s13 }
  0x26   : > { %s314_s10 = sshll.u32 %s312_s27, 4  ;;  %s316_s2 = sshll.u32 %s307_s1, 4  ;;  %s315_s10 = int_to_ptr.hbm [resolvable:$true] %s314_s10  ;;  %s317_s2 = int_to_ptr.vmem [resolvable:$true] %s316_s2 }
  0x27   : > { %s304_s11 = scalar_lea.sflag [#allocation13], %s1201_s30  ;;  %325 = sbr.rel (%p1217_p12) target bundleno = 644 (0x284), region = 40 }
  0x28   : > { %838 = dma.hbm_to_vmem [thread:$0]  (!%p1205_p9), %s315_s10, 32, %s317_s2, %s304_s11  }
  0x29   : > { %s327_s25 = sand.u32 (!%p1217_p12), 1, %s1096_s19  }
  0x2a   : > { %s791_s29 = sshll.u32 (!%p1217_p12), %s327_s25, 2  ;;  %s328_s16 = scalar_lea.sflag (!%p1217_p12), [#allocation7], %s327_s25 }
  0x2b   : > { %s331_s12 = scalar_lea.vmem (!%p1217_p12), [#allocation6], %s791_s29 }
  0x2c   : > { %1075 = dma.done.wait (%p1192_p7), %s328_s16, 64  }
  0x2d   : > { %1077 = vsyncadd (%p1192_p7), %s328_s16, 4294967232  ;;  %s337_s1 = sand.u32 1, %s1179_s24   ;;  %s341_s8 = scalar_lea.vmem [#allocation9], %s791_s29 }
  0x2e   : > { %s338_s30 = scalar_lea.sflag [#allocation10], %s337_s1 }
  0x2f   : > { %1079 = dma.done.wait (%p1192_p7), %s338_s30, 96  }
  0x30   : > { %1081 = vsyncadd (%p1192_p7), %s338_s30, 4294967200  ;;  %s793_s17 = sshll.u32 %s327_s25, 1  ;;  %s358_s9 = scalar_lea.sflag [#allocation13], %s327_s25 }
  0x31   : > { %s351_s13 = scalar_lea.vmem [#allocation11], %s793_s17  ;;  %s361_s14 = scalar_lea.vmem [#allocation12], %s793_s17 }
  0x32   : > { %1083 = dma.done.wait (%p1192_p7), %s358_s9, 32  }
  0x33   : > { %1085 = vsyncadd (%p1192_p7), %s358_s9, 4294967264  ;;  %p416_p13 = scmp.eq.s32.totalorder %s1104_s21, 0 }
  0x34   : > { %vm421_vm0 = vcmask (%p416_p13), 0   ;;  %v1114_v0 = vmov (%p416_p13), 0.0  }
  0x35   : > { %420 = sbr.rel (!%p416_p13) target bundleno = 58 (0x3a), region = 60  ;;  %422 = vst.msk [vmem:[#allocation2] sm:$0x1] (%p416_p13), %vm421_vm0, %v1114_v0 }
  0x36   : > { %423 = vst.msk [vmem:[#allocation3] sm:$0x1] (%p416_p13), %vm421_vm0, %v1114_v0 }
  0x37   : > { %424 = vst.msk [vmem:[#allocation4] sm:$0x1] (%p416_p13), %vm421_vm0, %v1114_v0 }
  0x3a PF: > { %p796_p0 = scmp.ne.s32.totalorder %s1104_s21, 0 }
  0x3c   : > { %427 = sbr.rel (%p796_p0) target bundleno = 67 (0x43), region = 64 }
  0x41   : > { %v1115_v1 = vmov 0.0  }
  0x42   : > { %428 = vst [vmem:[#allocation5] sm:$0xf] %v1115_v1 }
  0x43 PF: > { %v429_v2 = vld [vmem:[%s331_s12] sm:$0xf]  ;;  %v431_v3 = vld [vmem:[%s351_s13] sm:$0x3]  ;;  %v430_v6 = vld [vmem:[%s341_s8] sm:$0xf] }
  0x44   : > { %440 = vst [vmem:[#allocation1] ss:$4 sm:$0xff] %v429_v2  ;;  %v435_v4 = vperm.slane %v431_v3, 0  ;;  %v436_v5 = vperm.slane %v431_v3, 1  ;;  %v432_v7 = vld [vmem:[%s361_s14] sm:$0x3] }
  0x45   : > { %v433_v8 = vld [vmem:[%s1300_s0] sm:$0x3]  ;;  %v1116_v11 = vmov 0   ;;  %v459_v14 = vperm.slane %v432_v7, 0  ;;  %v460_v15 = vperm.slane %v432_v7, 1  ;;  %vm468_vm1 = vcmask 1041408  }
  0x46   : > { %896 = vset.pattern.permute.xlu1 %v1116_v11  ;;  %897 = vset.pattern.permute.xlu0 %v1116_v11  ;;  %p549_p1 = scmp.eq.s32.totalorder %s1104_s21, 3  ;;  %vm492_vm2 = vcmask 0   ;;  %p797_p2 = scmp.ne.s32.totalorder %s1104_s21, 3 }
  0x47   : > { %530 = vperm.xlu1 %896, %v433_v8  }
  0x49   : > { %v539_v55 = vld [vmem:[#allocation5] sm:$0xf] }
  0x4b   : > { %v441_v9 = vld.sshfl [vmem:[#allocation1] sm:$0xff pattern:$0x73625140]  ;;  %v442_v10 = vld.sshfl [vmem:[#allocation1 + $0x8] sm:$0xff pattern:$0x73625140] }
  0x4c   : > { %v445_v12 = vmul.f32 %v441_v9, %v435_v4  ;;  %v446_v13 = vmul.f32 %v442_v10, %v436_v5  ;;  %448 = vst [vmem:[#allocation1] ss:$4 sm:$0xff] %v430_v6  ;;  %v455_v9 = vld [vmem:[#allocation2] sm:$0x1] }
  0x4e   : > { %v456_v16 = vmul.f32 0.5, %v445_v12  ;;  %v457_v17 = vmul.f32 0.5, %v446_v13 }
  0x50   : > { %v463_v18 = vadd.f32 %v459_v14, %v456_v16  ;;  %v464_v19 = vadd.f32 %v460_v15, %v457_v17 }
  0x52   : > { %v467_v20 = vrot.slane %v464_v19, 6 }
  0x53   : > { %v449_v21 = vld.sshfl [vmem:[#allocation1] sm:$0xff pattern:$0x73625140]  ;;  %v450_v22 = vld.sshfl [vmem:[#allocation1 + $0x8] sm:$0xff pattern:$0x73625140] }
  0x54   : > { %v453_v23 = vmul.f32 %v449_v21, %v435_v4  ;;  %v454_v24 = vmul.f32 %v450_v22, %v436_v5  ;;  %v469_v25 = vsel %vm468_vm1, %v463_v18, %v467_v20 }
  0x55   : > { %v471_v26 = vmul.f32 %v469_v25, %v429_v2 }
  0x56   : > { %v495_v27 = vmul.f32 0.5, %v453_v23  ;;  %v496_v28 = vmul.f32 0.5, %v454_v24  ;;  %v526_v45 = vsub.f32 %v445_v12, %v453_v23  ;;  %v527_v46 = vsub.f32 %v446_v13, %v454_v24  ;;  %v494_v12 = vld [vmem:[#allocation3] sm:$0x1] }
  0x57   : > { %473 = vst [vmem:[#allocation1] ss:$4 sm:$0xff] %v471_v26 }
  0x58   : > { %v497_v29 = vadd.f32 %v495_v27, %v459_v14  ;;  %v498_v30 = vadd.f32 %v496_v28, %v460_v15 }
  0x5a   : > { %v501_v31 = vrot.slane %v498_v30, 6 }
  0x5c   : > { %v502_v32 = vsel %vm468_vm1, %v497_v29, %v501_v31 }
  0x5d   : > { %v504_v33 = vmul.f32 %v502_v32, %v430_v6 }
  0x5e   : > { %v474_v34 = vld.sshfl [vmem:[#allocation1] sm:$0xff pattern:$0x73625140]  ;;  %v475_v35 = vld.sshfl [vmem:[#allocation1 + $0x8] sm:$0xff pattern:$0x73625140] }
  0x5f   : > { %v478_v36 = vsel %vm468_vm1, %v474_v34, 0.0  ;;  %v479_v37 = vsel %vm468_vm1, %v475_v35, 0.0  ;;  %506 = vst [vmem:[#allocation1] ss:$4 sm:$0xff] %v504_v33 }
  0x60   : > { %v480_v38 = vadd.f32 %v479_v37, %v478_v36 }
  0x62   : > { %481 = vadd.xlane.f32.xlu0 %v480_v38 }
  0x66   : > { %v507_v39 = vld.sshfl [vmem:[#allocation1] sm:$0xff pattern:$0x73625140]  ;;  %v508_v40 = vld.sshfl [vmem:[#allocation1 + $0x8] sm:$0xff pattern:$0x73625140] }
  0x67   : > { %v511_v41 = vsel %vm468_vm1, %v507_v39, 0.0  ;;  %v512_v42 = vsel %vm468_vm1, %v508_v40, 0.0 }
  0x68   : > { %v513_v43 = vadd.f32 %v512_v42, %v511_v41 }
  0x6a   : > { %514 = vadd.xlane.f32.xlu0 %v513_v43 }
  0xb9   : > { %v531_v44 = vpop.permute.xlu1 %530 }
  0xba   : > { %v533_v47 = vmul.f32 %v531_v44, %v526_v45  ;;  %v534_v48 = vmul.f32 %v531_v44, %v527_v46 }
  0xbc   : > { %v535_v49 = vadd.f32 %v533_v47, %v453_v23  ;;  %v536_v50 = vadd.f32 %v534_v48, %v454_v24 }
  0xbe   : > { %v537_v51 = vadd.f32 %v535_v49, %v459_v14  ;;  %v538_v52 = vadd.f32 %v536_v50, %v460_v15 }
  0xc0   : > { %v540_v53 = vmul.f32 %v537_v51, %v537_v51  ;;  %v541_v54 = vmul.f32 %v538_v52, %v538_v52 }
  0xc2   : > { %v544_v56 = vrot.slane %v541_v54, 6 }
  0xc4   : > { %v545_v59 = vsel %vm468_vm1, %v540_v53, %v544_v56 }
  0xc5   : > { %v547_v60 = vadd.f32 %v545_v59, %v539_v55 }
  0xc7   : > { %548 = vst [vmem:[#allocation5] sm:$0xf] %v547_v60 }
  0xd5   : > { %v482_v57 = vpop.xlane.xlu0 %481 }
  0xd6   : > { %v483_v58 = vrot.slane %v482_v57, 4 }
  0xd8   : > { %v484_v61 = vadd.f32 %v483_v58, %v482_v57 }
  0xda   : > { %v485_v62 = vrot.slane %v484_v61, 2 }
  0xdc   : > { %v486_v63 = vadd.f32 %v485_v62, %v484_v61 }
  0xdd   : > { %v515_v0 = vpop.xlane.xlu0 %514 }
  0xde   : > { %v516_v1 = vrot.slane %v515_v0, 4  ;;  %v487_v2 = vrot.slane %v486_v63, 1 }
  0xe0   : > { %v517_v3 = vadd.f32 %v516_v1, %v515_v0  ;;  %v488_v4 = vadd.f32 %v487_v2, %v486_v63 }
  0xe2   : > { %v518_v5 = vrot.slane %v517_v3, 2  ;;  %808 = vpush %v488_v4 }
  0xe4   : > { %v519_v6 = vadd.f32 %v518_v5, %v517_v3 }
  0xe6   : > { %v520_v7 = vrot.slane %v519_v6, 1 }
  0xe8   : > { %v521_v8 = vadd.f32 %v520_v7, %v519_v6 }
  0xea   : > { %810 = vpush %v521_v8 }
 0x113   : > { %s809_s18 = spop %808 }
 0x114   : > { %v490_v10 = vstv %s809_s18 }
 0x115   : > { %v491_v11 = vadd.f32 %v490_v10, %v455_v9 }
 0x117   : > { %493 = vst.msk [vmem:[#allocation2] sm:$0x1] %vm492_vm2, %v491_v11 }
 0x11b   : > { %s811_s6 = spop %810  ;;  %552 = sbr.rel (%p797_p2) target bundleno = 507 (0x1fb), region = 68 }
 0x11c   : > { %v523_v13 = vstv %s811_s6 }
 0x11d   : > { %v524_v14 = vadd.f32 %v523_v13, %v494_v12 }
 0x11f   : > { %525 = vst.msk [vmem:[#allocation3] sm:$0x1] %vm492_vm2, %v524_v14 }
 0x120   : > { %v553_v15 = vld [vmem:[#allocation5] sm:$0xf]  ;;  %v566_v40 = vld [vmem:[#allocation4] sm:$0x1] }
 0x121   : > { %898 = vrsqrt.f32 %v553_v15  ;;  %vm561_vm3 = vcmp.eq.f32.partialorder %v553_v15, inf  ;;  %v564_v22 = vand.u32 2147483648, %v553_v15  ;;  %vm563_vm4 = vcmp.eq.f32.partialorder %v553_v15, 0.0 }
 0x127   : > { %v899_v16 = vpop.eup %898 }
 0x128   : > { %v555_v17 = vmul.f32 %v899_v16, %v553_v15 }
 0x12a   : > { %v556_v18 = vmul.f32 %v899_v16, %v555_v17 }
 0x12c   : > { %v557_v19 = vmul.f32 0.5, %v556_v18 }
 0x12e   : > { %v558_v20 = vsub.f32 1.5, %v557_v19 }
 0x130   : > { %v559_v21 = vmul.f32 %v899_v16, %v558_v20 }
 0x132   : > { %v560_v23 = vmul.f32 %v559_v21, %v553_v15 }
 0x134   : > { %v562_v24 = vsel %vm561_vm3, %v553_v15, %v560_v23 }
 0x135   : > { %v565_v25 = vsel %vm563_vm4, %v564_v22, %v562_v24 }
 0x136   : > { %v798_v26 = vadd.f32 -1.0, %v565_v25 }
 0x138   : > { %v568_v27 = vmul.f32 %v798_v26, %v798_v26 }
 0x13a   : > { %570 = vst [vmem:[#allocation1] ss:$4 sm:$0xff] %v568_v27 }
 0x141   : > { %v571_v28 = vld.sshfl [vmem:[#allocation1] sm:$0xff pattern:$0x73625140]  ;;  %v572_v29 = vld.sshfl [vmem:[#allocation1 + $0x8] sm:$0xff pattern:$0x73625140] }
 0x142   : > { %v575_v30 = vsel %vm468_vm1, %v571_v28, 0.0  ;;  %v576_v31 = vsel %vm468_vm1, %v572_v29, 0.0 }
 0x143   : > { %v577_v32 = vadd.f32 %v576_v31, %v575_v30 }
 0x145   : > { %578 = vadd.xlane.f32.xlu0 %v577_v32 }
 0x1b8   : > { %v579_v33 = vpop.xlane.xlu0 %578 }
 0x1b9   : > { %v580_v34 = vrot.slane %v579_v33, 4 }
 0x1bb   : > { %v581_v35 = vadd.f32 %v580_v34, %v579_v33 }
 0x1bd   : > { %v582_v36 = vrot.slane %v581_v35, 2 }
 0x1bf   : > { %v583_v37 = vadd.f32 %v582_v36, %v581_v35 }
 0x1c1   : > { %v584_v38 = vrot.slane %v583_v37, 1 }
 0x1c3   : > { %v585_v39 = vadd.f32 %v584_v38, %v583_v37 }
 0x1c5   : > { %812 = vpush %v585_v39 }
 0x1f6   : > { %s813_s7 = spop %812 }
 0x1f7   : > { %v587_v41 = vstv %s813_s7 }
 0x1f8   : > { %v588_v42 = vadd.f32 %v587_v41, %v566_v40 }
 0x1fa   : > { %589 = vst.msk [vmem:[#allocation4] sm:$0x1] %vm492_vm2, %v588_v42 }
 0x1fb PF: > { %593 = sbr.rel (!%p549_p1) target bundleno = 638 (0x27e), region = 72  ;;  %s1117_s26 = smov (%p549_p1), 1   ;;  %v594_v45 = vld [vmem:[#allocation2] sm:$0x1] (%p549_p1)  ;;  %vm602_vm5 = vcmask (%p549_p1), 8200   ;;  %vm610_vm6 = vcmask (%p549_p1), 16400  }
 0x1fc   : > { %s1118_s27 = smov (%p549_p1), 2   ;;  %595 = vst.msk [vmem:[#allocation14] sm:$0x1] (%p549_p1), %vm492_vm2, %v594_v45 }
 0x201   : > { %v900_v43 = vld [vmem:[#allocation3] ss:$0 sm:$0xff]  ;;  %v901_v44 = vld [vmem:[#allocation4] ss:$0 sm:$0xff] }
 0x202   : > { %599 = vrot.lane.b32.xlu0 %v900_v43, %s1117_s26 }
 0x20a   : > { %607 = vrot.lane.b32.xlu0 %v901_v44, %s1118_s27 }
 0x274   : > { %v600_v46 = vpop.permute.xlu0 %599 }
 0x275   : > { %603 = vst.msk [vmem:[#allocation14] sm:$0x1] %vm602_vm5, %v600_v46 }
 0x27c   : > { %v608_v47 = vpop.permute.xlu0 %607 }
 0x27d   : > { %611 = vst.msk [vmem:[#allocation14] sm:$0x1] %vm610_vm6, %v608_v47 }
 0x27e PF: > { %p840_p3 = scmp.eq.s32.totalorder %s1179_s24, 3  ;;  %s621_s2 = sshll.u32 %s1305_s5, 4  ;;  %s622_s2 = int_to_ptr.hbm [resolvable:$true] %s621_s2 }
 0x27f   : > { %s1119_s11 = smov [#allocation14]  }
 0x280   : > { %s619_s25 = sshll.u32 %s1119_s11, 4  ;;  %s620_s25 = int_to_ptr.vmem [resolvable:$true] %s619_s25 }
 0x281   : > { %823 = dma.vmem_to_hbm [thread:$0]  (%p840_p3), %s620_s25, 16, %s622_s2, [#allocation8]  }
 0x282   : > { %1087 = dma.done.wait (%p840_p3), [#allocation8], 16  }
 0x283   : > { %1089 = vsyncadd (%p840_p3), [#allocation8], 4294967280 }
 0x284 PF: > { %s25_s23 = sadd.s32 1, %s1112_s23   ;;  %s1316_s29 = sld [smem:[#allocation20_spill]] }
 0x285   : > { %p22_p4 = scmp.ge.s32.totalorder %s25_s23, 6   ;;  %s1317_s24 = sld [smem:[#allocation19_spill]] }
 0x286   : > { %s1318_s18 = smov %s1096_s19  ;;  %s1319_s19 = smov %s1100_s20 }
 0x287   : > { %s1321_s21 = smov %s1108_s22  ;;  %24 = sbr.rel (!%p22_p4) target bundleno = 12 (0xc), region = 134 }
 0x28a   : > { %s1320_s20 = smov %s1316_s29 }
 0x28b   : > { %s1322_s22 = smov %s1317_s24 }
 0x28c   :  { %635 = vsyncpa [#allocation7], 1 }
 0x28d   :  { %637 = vsyncpa [#allocation7 + $0x1], 1 }
 0x28e   :  { %638 = vsyncpa [#allocation10], 1 }
 0x28f   :  { %640 = vsyncpa [#allocation10 + $0x1], 1 }
 0x290   :  { %641 = vsyncpa [#allocation13], 1 }
 0x291   :  { %643 = vsyncpa [#allocation13 + $0x1], 1 }
 0x292   :  { %644 = vsyncpa [#allocation8], 1 }
 0x293   :  { %646 = vsyncpa [#allocation8 + $0x1], 1 }

</bundles_post_ra>
